<compile_context>
chip_gen: v6e
topology: v6e:2x2x1
jax: 0.10.0
libtpu: 0.0.40
codegen_flags: <defaults>
</compile_context>

<pallas_src>
import functools

import jax
import jax.numpy as jnp
from jax.experimental import pallas as pl
from jax.experimental.pallas import tpu as pltpu

_LANE_CHOICES = (1024, 512, 256, 128)
_TARGET_BLOCK_BYTES = 2 * 1024 * 1024  # ~2 MiB per input block


def _clipped_relu_kernel(params_ref, x_ref, o_ref, *, dequantize):
    # params_ref: SMEM f32[3] = [alpha, scale, inv_scale]
    # x_ref / o_ref: (block_rows, lanes) VMEM tiles.
    alpha = params_ref[0]
    scale = params_ref[1]
    inv_scale = params_ref[2]

    x = x_ref[...].astype(jnp.float32)
    x = jnp.maximum(x, 0.0)                 # F.relu
    x = jnp.where(x < alpha, x, alpha)      # clip at alpha
    q = jnp.round(x * scale)                # STE quantizer forward (zero_point = 0)
    y = q * inv_scale if dequantize else q  # dequantize via multiply, not divide
    o_ref[...] = y.astype(o_ref.dtype)


def clipped_relu(x, alpha, *, num_bits, dequantize=True):
    """x: any-shape float array (e.g. NCHW activations). alpha: shape (1,) float."""
    orig_shape = x.shape
    orig_dtype = x.dtype
    total = x.size

    # Keep bf16 / f32 activations in their native dtype for HBM traffic;
    # anything else is computed in f32.
    if x.dtype in (jnp.dtype(jnp.bfloat16), jnp.dtype(jnp.float32)):
        compute_dtype = x.dtype
    else:
        compute_dtype = jnp.dtype(jnp.float32)
    flat = x.reshape(-1).astype(compute_dtype)

    # Lane-dense 2D layout: widest lane width dividing the element count, so
    # the reshape is free (no pad, no extra HBM copy).
    lanes = None
    for w in _LANE_CHOICES:
        if total % w == 0:
            lanes = w
            break
    pad = 0
    if lanes is None:  # fallback: pad the tail up to a multiple of 128 lanes
        lanes = 128
        pad = (-total) % lanes
        flat = jnp.pad(flat, (0, pad))
    rows = (total + pad) // lanes
    x2d = flat.reshape(rows, lanes)

    # ~2 MiB input blocks; row count multiple of 32 keeps sublane tiling legal
    # for both f32 (8) and bf16 (16). Double-buffered in+out fits the scoped
    # VMEM default on v5e/v6e/v7x without raising vmem_limit_bytes.
    bytes_per_row = lanes * jnp.dtype(compute_dtype).itemsize
    block_rows = max(32, (_TARGET_BLOCK_BYTES // bytes_per_row) // 32 * 32)
    if block_rows >= rows:
        block_rows = rows  # single full-array block
    grid = pl.cdiv(rows, block_rows)  # ragged tail handled by Pallas masking

    levels = float((1 << num_bits) - 1)
    a = alpha.astype(jnp.float32).reshape(())
    params = jnp.stack([a, levels / a, a / levels])  # [alpha, scale, 1/scale]

    kernel = functools.partial(_clipped_relu_kernel, dequantize=dequantize)

    out2d = pl.pallas_call(
        kernel,
        out_shape=jax.ShapeDtypeStruct((rows, lanes), compute_dtype),
        grid=(grid,),
        in_specs=[
            pl.BlockSpec(memory_space=pltpu.SMEM),                # params scalars
            pl.BlockSpec((block_rows, lanes), lambda i: (i, 0)),  # x tile
        ],
        out_specs=pl.BlockSpec((block_rows, lanes), lambda i: (i, 0)),
        compiler_params=pltpu.CompilerParams(
            dimension_semantics=("parallel",),  # megacore-shardable on v7x
        ),
    )(params, x2d)

    out = out2d.reshape(-1)
    if pad:
        out = out[:total]
    return out.reshape(orig_shape).astype(orig_dtype)


def clipped_relu_ref(x, alpha, *, num_bits, dequantize=True):
    """Plain-JAX reference matching the PyTorch module."""
    a = alpha[0]
    scale = ((1 << num_bits) - 1) / a
    x = jnp.maximum(x.astype(jnp.float32), 0.0)
    x = jnp.where(x < a, x, a)
    q = jnp.round(x * scale)
    return q / scale if dequantize else q


if __name__ == "__main__":
    key = jax.random.PRNGKey(0)

    # Module init: nn.Parameter(torch.Tensor([alpha])) with alpha=8.0.
    num_bits = 4
    alpha = jnp.array([8.0], dtype=jnp.float32)

    # --- f32 NCHW activations, nicely divisible size (no padding path) ---
    x = jax.random.normal(key, (2, 4, 16, 16), dtype=jnp.float32) * 5.0
    y = jax.block_until_ready(clipped_relu(x, alpha, num_bits=num_bits, dequantize=True))
    y_ref = clipped_relu_ref(x, alpha, num_bits=num_bits, dequantize=True)
    assert y.shape == x.shape and y.dtype == x.dtype
    assert jnp.allclose(y, y_ref, atol=1e-5), "f32 mismatch vs reference"

    # --- ragged size (exercises the pad fallback + masked tail block) ---
    x_odd = jax.random.normal(jax.random.PRNGKey(1), (3, 5, 7, 11), dtype=jnp.float32) * 5.0
    y_odd = jax.block_until_ready(clipped_relu(x_odd, alpha, num_bits=num_bits))
    y_odd_ref = clipped_relu_ref(x_odd, alpha, num_bits=num_bits)
    assert jnp.allclose(y_odd, y_odd_ref, atol=1e-5), "ragged mismatch vs reference"

    # --- bf16 activations stay bf16 end-to-end (halved HBM traffic) ---
    x_bf16 = (jax.random.normal(jax.random.PRNGKey(2), (2, 4, 16, 16)) * 5.0).astype(jnp.bfloat16)
    y_bf16 = jax.block_until_ready(clipped_relu(x_bf16, alpha, num_bits=num_bits))
    y_bf16_ref = clipped_relu_ref(x_bf16.astype(jnp.float32), alpha, num_bits=num_bits)
    assert y_bf16.dtype == jnp.bfloat16
    assert jnp.allclose(y_bf16.astype(jnp.float32), y_bf16_ref, atol=7e-2), "bf16 mismatch"

    print("KERNEL_OK")
</pallas_src>

<mosaic_0001>
module attributes {stable_mosaic.version = 11 : i64} {
  func.func @_clipped_relu_kernel(%arg0: i32, %arg1: memref<3xf32, #tpu.memory_space<smem>>, %arg2: memref<2x1024xf32, #tpu.memory_space<vmem>>, %arg3: memref<2x1024xf32, #tpu.memory_space<vmem>>) attributes {dimension_semantics = [#tpu.dimension_semantics<parallel>], iteration_bounds = array<i64: 1>, scalar_prefetch = 0 : i64, scratch_operands = 0 : i64, tpu.core_type = #tpu.core_type<tc>, window_params = [{transform_indices = @transform_0, window_bounds = array<i64: 3>}, {transform_indices = @transform_1, window_bounds = array<i64: 2, 1024>}, {transform_indices = @transform_2, window_bounds = array<i64: 2, 1024>}]} {
    %c0 = arith.constant 0 : index
    %0 = memref.load %arg1[%c0] : memref<3xf32, #tpu.memory_space<smem>>
    %c1 = arith.constant 1 : index
    %1 = memref.load %arg1[%c1] : memref<3xf32, #tpu.memory_space<smem>>
    %c2 = arith.constant 2 : index
    %2 = memref.load %arg1[%c2] : memref<3xf32, #tpu.memory_space<smem>>
    %c0_0 = arith.constant 0 : index
    %c0_1 = arith.constant 0 : index
    %3 = vector.load %arg2[%c0_0, %c0_1] : memref<2x1024xf32, #tpu.memory_space<vmem>>, vector<2x1024xf32>
    %cst = arith.constant 0.000000e+00 : f32
    %4 = vector.broadcast %cst : f32 to vector<2x1024xf32>
    %5 = arith.maximumf %3, %4 : vector<2x1024xf32>
    %6 = vector.broadcast %0 : f32 to vector<2x1024xf32>
    %7 = arith.cmpf olt, %5, %6 : vector<2x1024xf32>
    %8 = vector.broadcast %0 : f32 to vector<2x1024xf32>
    %9 = arith.select %7, %5, %8 : vector<2x1024xi1>, vector<2x1024xf32>
    %10 = vector.broadcast %1 : f32 to vector<2x1024xf32>
    %11 = arith.mulf %9, %10 : vector<2x1024xf32>
    %12 = math.roundeven %11 : vector<2x1024xf32>
    %13 = vector.broadcast %2 : f32 to vector<2x1024xf32>
    %14 = arith.mulf %12, %13 : vector<2x1024xf32>
    %c0_2 = arith.constant 0 : index
    %c0_3 = arith.constant 0 : index
    %15 = vector.load %arg3[%c0_2, %c0_3] : memref<2x1024xf32, #tpu.memory_space<vmem>>, vector<2x1024xf32>
    tpu.vector_store %arg3[%c0_2, %c0_3], %14 {strides = array<i32>} : memref<2x1024xf32, #tpu.memory_space<vmem>>, vector<2x1024xf32>,
    return
  }
  func.func @transform_0(%arg0: i32) -> i32 {
    %c0_i32 = arith.constant 0 : i32
    %c0_i32_0 = arith.constant 0 : i32
    return %c0_i32 : i32
  }
  func.func @transform_1(%arg0: i32) -> (i32, i32) {
    %c0_i32 = arith.constant 0 : i32
    %c0_i32_0 = arith.constant 0 : i32
    return %arg0, %c0_i32 : i32, i32
  }
  func.func @transform_2(%arg0: i32) -> (i32, i32) {
    %c0_i32 = arith.constant 0 : i32
    %c0_i32_0 = arith.constant 0 : i32
    return %arg0, %c0_i32 : i32, i32
  }
}

</mosaic_0001>

<bundles_post_ra>
// kernel: tpu_custom_call.1
= control target key start
LH: loop header
LB: loop body
LE: loop exit
PB: predicated region body
PF: predicated region fallthrough
CT: control target
= control target key end

     0   :  { %7 = vsyncpa [#allocation5], 0  ;;  %s175_s0 = inlined_call_operand.hbm [shape: f32[3], index: 0, kind: input, shape index: {}]   ;;  %s176_s1 = inlined_call_operand.hbm [shape: f32[2,1024], index: 1, kind: input, shape index: {}]   ;;  %s177_s2 = inlined_call_operand.hbm [shape: f32[2,1024], index: 2, kind: output, shape index: {}]  }
   0x1   :  { %8 = vsyncpa [#allocation3], 0 }
   0x2   :  { %9 = vsyncpa [#allocation4], 0  ;;  %s148_s9 = smov [#allocation2]   ;;  %s149_s12 = smov [#allocation6]  }
   0x3   :  { %17 = dma.hbm_to_smem %s175_s0, 16, %s148_s9, [#allocation5]  }
   0x4   :  { %s24_s13 = sshll.u32 %s149_s12, 4  ;;  %s25_s13 = int_to_ptr.vmem [resolvable:$true] %s24_s13 }
   0x5   :  { %s110_s14 = scalar_lea.vmem %s25_s13, 256  ;;  %p115_p1 = scmp.lt.s32.totalorder %s25_s13, %s25_s13 }
   0x6   :  { %p111_p0 = scmp.ne.s32.totalorder %s25_s13, %s110_s14  ;;  %p116_p2 = scmp.lt.s32.totalorder %s110_s14, %s110_s14 }
   0x8   :  { %p117_p3 = por %p116_p2, %p115_p1 }
   0xa   :  { %p118_p4 = pnand %p117_p3, %p111_p0 }
   0xc   :  { %121 = shalt.err (!%p118_p4)
}
   0xd   :  { %27 = dma.hbm_to_vmem [thread:$0]  %s176_s1, 256, %s25_s13, [#allocation3]  }
   0xe   :  { %142 = dma.done.wait [#allocation5], 16  }
   0xf   :  { %143 = vsyncadd [#allocation5], 4294967280 }
  0x10   :  { %144 = dma.done.wait [#allocation3], 256  }
  0x11   :  { %145 = vsyncadd [#allocation3], 4294967040 }
  0x12   :  { %34 = sfence }
  0x13   :  { %s35_s0 = sld [smem:[#allocation2]]  ;;  %v38_v0 = vld [vmem:[#allocation6] sm:$0xff]  ;;  %v39_v1 = vld [vmem:[#allocation6 + $0x8] sm:$0xff]  ;;  %s150_s1 = smov [#allocation7]  }
  0x14   :  { %s73_s17 = sld [smem:[#allocation2 + $0x1]]  ;;  %v40_v2 = vmax.f32 %v38_v0, 0.0  ;;  %v41_v3 = vmax.f32 %v39_v1, 0.0  ;;  %s63_s19 = sshll.u32 %s150_s1, 4  ;;  %s64_s19 = int_to_ptr.vmem [resolvable:$true] %s63_s19 }
  0x15   :  { %s74_s18 = sld [smem:[#allocation2 + $0x2]]  ;;  %s122_s20 = scalar_lea.vmem %s64_s19, 256 }
  0x16   :  { %p123_p5 = scmp.ne.s32.totalorder %s64_s19, %s122_s20  ;;  %p127_p6 = scmp.lt.s32.totalorder %s64_s19, %s64_s19 }
  0x17   :  { %p128_p7 = scmp.lt.s32.totalorder %s122_s20, %s122_s20 }
  0x19   :  { %v42_v4 = vstv %s35_s0  ;;  %p129_p8 = por %p128_p7, %p127_p6 }
  0x1a   :  { %vm43_vm0 = vcmp.lt.f32.partialorder %v40_v2, %v42_v4  ;;  %v47_v5 = vstv %s73_s17  ;;  %vm44_vm1 = vcmp.lt.f32.partialorder %v41_v3, %v42_v4 }
  0x1b   :  { %v45_v6 = vsel %vm43_vm0, %v40_v2, %v42_v4  ;;  %v46_v7 = vsel %vm44_vm1, %v41_v3, %v42_v4  ;;  %v52_v21 = vstv %s74_s18  ;;  %p130_p9 = pnand %p129_p8, %p123_p5 }
  0x1c   :  { %v48_v8 = vmul.f32 %v47_v5, %v45_v6  ;;  %v49_v9 = vmul.f32 %v47_v5, %v46_v7 }
  0x1e   :  { %v77_v10 = vcvt.f32.s32 %v48_v8  ;;  %v75_v11 = vand.u32 2147483647, %v48_v8  ;;  %v85_v12 = vcvt.f32.s32 %v49_v9  ;;  %v80_v14 = vand.u32 2147483648, %v48_v8 }
  0x1f   :  { %v83_v15 = vand.u32 2147483647, %v49_v9  ;;  %v88_v17 = vand.u32 2147483648, %v49_v9 }
  0x20   :  { %v78_v13 = vcvt.s32.f32 %v77_v10  ;;  %v86_v16 = vcvt.s32.f32 %v85_v12  ;;  %vm76_vm2 = vcmp.lt.f32.partialorder %v75_v11, 8388608.0 }
  0x21   :  { %vm84_vm3 = vcmp.lt.f32.partialorder %v83_v15, 8388608.0 }
  0x22   :  { %v79_v18 = vand.u32 2147483647, %v78_v13  ;;  %v87_v19 = vand.u32 2147483647, %v86_v16 }
  0x24   :  { %v81_v20 = vor.u32 %v80_v14, %v79_v18  ;;  %v89_v22 = vor.u32 %v88_v17, %v87_v19 }
  0x26   :  { %v82_v23 = vsel %vm76_vm2, %v81_v20, %v48_v8  ;;  %v90_v25 = vsel %vm84_vm3, %v89_v22, %v49_v9 }
  0x27   :  { %v53_v24 = vmul.f32 %v82_v23, %v52_v21  ;;  %v54_v26 = vmul.f32 %v90_v25, %v52_v21 }
  0x29   :  { %55 = vst [vmem:[#allocation7] sm:$0xff] %v53_v24  ;;  %56 = vst [vmem:[#allocation7 + $0x8] sm:$0xff] %v54_v26 }
  0x2a   :  { %133 = shalt.err (!%p130_p9)
}
  0x2b   :  { %66 = dma.vmem_to_hbm [thread:$0]  %s64_s19, 256, %s177_s2, [#allocation4]  }
  0x2c   :  { %146 = dma.done.wait [#allocation4], 256  }
  0x2d   :  { %147 = vsyncadd [#allocation4], 4294967040 }
  0x2e   :  { %70 = vsyncpa [#allocation3], 1 }
  0x2f   :  { %71 = vsyncpa [#allocation4], 1 }
  0x30   :  { %72 = vsyncpa [#allocation5], 1 }

</bundles_post_ra>
